<compile_context>
chip_gen: v7x
topology: tpu7x:2x2x1
jax: 0.10.0
libtpu: 0.0.40
codegen_flags: <defaults>
</compile_context>

<pallas_src>
import jax
import jax.numpy as jnp
from jax.experimental import pallas as pl
from jax.experimental.pallas import tpu as pltpu

_LANE = 128      # vreg lane width (last-dim tile quantum)
_SUBLANE = 8     # f32 sublane quantum
_MAX_TM = 1024   # 1024 x 128 x f32 = 512 KiB per block


def _add_one_kernel(x_ref, o_ref):
    # Elementwise hot path: literal immediate add -> a single VPU op per vreg.
    o_ref[...] = x_ref[...] + 1.0


def _round_up(v, m):
    return ((v + m - 1) // m) * m


def todui_forward(x):
    """Replicates Todui.forward: returns x + 1 (same shape, float32)."""
    x = jnp.asarray(x, dtype=jnp.float32)
    orig_shape = x.shape
    total = x.size

    if total == 0:
        return x

    # ---- Scalar / sub-vreg fast path (the spec's x = tensor(1.0)) ----------
    # A Pallas launch costs ~0.35 us of grid-step overhead plus HBM->VMEM->HBM
    # DMAs of a whole padded vreg tile; for fewer than one vreg of data the
    # single add is cheaper done directly (XLA fuses it for free).
    if total < _SUBLANE * _LANE:
        return x + 1.0

    # ---- General tensor path: lane-dense tiled grid --------------------------
    flat = x.reshape(-1)
    rows = -(-total // _LANE)                      # ceil(total / 128)
    tm = min(_MAX_TM, _round_up(rows, _SUBLANE))   # sublane-aligned row tile
    padded_rows = _round_up(rows, tm)
    padded_total = padded_rows * _LANE
    if padded_total != total:
        flat = jnp.pad(flat, (0, padded_total - total))
    x2d = flat.reshape(padded_rows, _LANE)         # contiguous per row-tile

    out2d = pl.pallas_call(
        _add_one_kernel,
        out_shape=jax.ShapeDtypeStruct((padded_rows, _LANE), jnp.float32),
        grid=(padded_rows // tm,),
        in_specs=[pl.BlockSpec((tm, _LANE), lambda i: (i, 0))],
        out_specs=pl.BlockSpec((tm, _LANE), lambda i: (i, 0)),
        compiler_params=pltpu.CompilerParams(
            # Row-tile axis is fully independent: lets Mosaic shard grid steps
            # across v7x's two TensorCores; harmless on v5e/v6e (1 TC).
            dimension_semantics=("parallel",),
        ),
    )(x2d)

    return out2d.reshape(-1)[:total].reshape(orig_shape)


if __name__ == "__main__":
    # 1) Mirror the PyTorch spec exactly: x = torch.tensor(1.0) -> 0-d scalar.
    x_scalar = jnp.asarray(1.0, dtype=jnp.float32)
    out_scalar = jax.block_until_ready(todui_forward(x_scalar))
    assert out_scalar.shape == x_scalar.shape, (out_scalar.shape, x_scalar.shape)
    assert out_scalar.dtype == jnp.float32
    assert jnp.allclose(out_scalar, x_scalar + 1.0), (out_scalar, x_scalar + 1.0)

    # 2) Exercise the tiled Pallas kernel on a small deterministic tensor.
    key = jax.random.PRNGKey(0)
    x_tensor = jax.random.normal(key, (2, 4, 16, 16), dtype=jnp.float32)
    out_tensor = jax.block_until_ready(todui_forward(x_tensor))
    assert out_tensor.shape == x_tensor.shape
    assert out_tensor.dtype == jnp.float32
    assert jnp.allclose(out_tensor, x_tensor + 1.0)

    print("KERNEL_OK")
</pallas_src>

<mosaic_0001>
module attributes {stable_mosaic.version = 11 : i64} {
  func.func @_add_one_kernel(%arg0: i32, %arg1: memref<16x128xf32, #tpu.memory_space<vmem>>, %arg2: memref<16x128xf32, #tpu.memory_space<vmem>>) attributes {dimension_semantics = [#tpu.dimension_semantics<parallel>], iteration_bounds = array<i64: 1>, scalar_prefetch = 0 : i64, scratch_operands = 0 : i64, tpu.core_type = #tpu.core_type<tc>, window_params = [{transform_indices = @transform_0, window_bounds = array<i64: 16, 128>}, {transform_indices = @transform_1, window_bounds = array<i64: 16, 128>}]} {
    %c0 = arith.constant 0 : index
    %c0_0 = arith.constant 0 : index
    %0 = vector.load %arg1[%c0, %c0_0] : memref<16x128xf32, #tpu.memory_space<vmem>>, vector<16x128xf32>
    %cst = arith.constant 1.000000e+00 : f32
    %1 = vector.broadcast %cst : f32 to vector<16x128xf32>
    %2 = arith.addf %0, %1 : vector<16x128xf32>
    %c0_1 = arith.constant 0 : index
    %c0_2 = arith.constant 0 : index
    %3 = vector.load %arg2[%c0_1, %c0_2] : memref<16x128xf32, #tpu.memory_space<vmem>>, vector<16x128xf32>
    tpu.vector_store %arg2[%c0_1, %c0_2], %2 {strides = array<i32>} : memref<16x128xf32, #tpu.memory_space<vmem>>, vector<16x128xf32>,
    return
  }
  func.func @transform_0(%arg0: i32) -> (i32, i32) {
    %c0_i32 = arith.constant 0 : i32
    %c0_i32_0 = arith.constant 0 : i32
    return %arg0, %c0_i32 : i32, i32
  }
  func.func @transform_1(%arg0: i32) -> (i32, i32) {
    %c0_i32 = arith.constant 0 : i32
    %c0_i32_0 = arith.constant 0 : i32
    return %arg0, %c0_i32 : i32, i32
  }
}

</mosaic_0001>

<bundles_post_ra>
// kernel: tpu_custom_call.1
= control target key start
LH: loop header
LB: loop body
LE: loop exit
PB: predicated region body
PF: predicated region fallthrough
CT: control target
= control target key end

     0   :  { %6 = vsyncpa [#allocation3], 0  ;;  %s136_s0 = inlined_call_operand.hbm [shape: f32[16,128], index: 0, kind: input, shape index: {}]   ;;  %s137_s1 = inlined_call_operand.hbm [shape: f32[16,128], index: 1, kind: output, shape index: {}]  }
   0x1   :  { %7 = vsyncpa [#allocation4], 0  ;;  %s98_s6 = smov [#allocation2]   ;;  %s50_s10 = scalar_lea.hbm %s136_s0, 256 }
   0x2   :  { %s13_s7 = sshll.u32 %s98_s6, 4  ;;  %p51_p0 = scmp.ne.s32.totalorder %s136_s0, %s50_s10  ;;  %s14_s7 = int_to_ptr.vmem [resolvable:$true] %s13_s7 }
   0x3   :  { %p54_p1 = scmp.lt.u32.totalorder %s50_s10, %s136_s0 }
   0x5   :  { %p56_p2 = pnand %p54_p1, %p51_p0 }
   0x7   :  { %59 = shalt.err (!%p56_p2)
}
   0x8   :  { %s60_s15 = scalar_lea.vmem %s14_s7, 256  ;;  %p65_p4 = scmp.lt.s32.totalorder %s14_s7, %s14_s7 }
   0x9   :  { %p61_p3 = scmp.ne.s32.totalorder %s14_s7, %s60_s15  ;;  %p66_p5 = scmp.lt.s32.totalorder %s60_s15, %s60_s15 }
   0xb   :  { %p67_p6 = por %p66_p5, %p65_p4 }
   0xd   :  { %p68_p7 = pnand %p67_p6, %p61_p3 }
   0xf   :  { %71 = shalt.err (!%p68_p7)
}
  0x10   :  { %s99_s16 = smov 128   ;;  %s100_s17 = smov 8  }
  0x11   :  { %19 = dma.hbm_to_vmem [thread:$0]  %s136_s0, 256, %s14_s7, [#allocation3], %s99_s16, %s99_s16, %s100_s17  }
  0x12   :  { %94 = dma.done.wait [#allocation3], 256  }
  0x13   :  { %95 = vsyncadd [#allocation3], 4294967040  ;;  %s101_s20 = smov [#allocation5]   ;;  %v23_v0 = vld [vmem:[#allocation2] sm:$0xff]  ;;  %v24_v1 = vld [vmem:[#allocation2 + $0x8] sm:$0xff] }
  0x14   :  { %s34_s21 = sshll.u32 %s101_s20, 4  ;;  %v25_v2 = vadd.f32 1.0, %v23_v0  ;;  %v26_v3 = vadd.f32 1.0, %v24_v1  ;;  %s35_s21 = int_to_ptr.vmem [resolvable:$true] %s34_s21 }
  0x15   :  { %s72_s22 = scalar_lea.vmem %s35_s21, 256  ;;  %p77_p9 = scmp.lt.s32.totalorder %s35_s21, %s35_s21 }
  0x16   :  { %27 = vst [vmem:[#allocation5] sm:$0xff] %v25_v2  ;;  %28 = vst [vmem:[#allocation5 + $0x8] sm:$0xff] %v26_v3  ;;  %p73_p8 = scmp.ne.s32.totalorder %s35_s21, %s72_s22  ;;  %p78_p10 = scmp.lt.s32.totalorder %s72_s22, %s72_s22 }
  0x18   :  { %p79_p11 = por %p78_p10, %p77_p9 }
  0x1a   :  { %p80_p12 = pnand %p79_p11, %p73_p8 }
  0x1c   :  { %83 = shalt.err (!%p80_p12)
}
  0x1d   :  { %s84_s24 = scalar_lea.hbm %s137_s1, 256 }
  0x1e   :  { %p85_p13 = scmp.ne.s32.totalorder %s137_s1, %s84_s24  ;;  %p88_p0 = scmp.lt.u32.totalorder %s84_s24, %s137_s1 }
  0x20   :  { %p90_p1 = pnand %p88_p0, %p85_p13 }
  0x22   :  { %93 = shalt.err (!%p90_p1)
}
  0x23   :  { %40 = dma.vmem_to_hbm [thread:$0]  %s35_s21, 256, %s137_s1, [#allocation4], %s99_s16, %s99_s16, %s100_s17  }
  0x24   :  { %96 = dma.done.wait [#allocation4], 256  }
  0x25   :  { %97 = vsyncadd [#allocation4], 4294967040 }
  0x26   :  { %44 = vsyncpa [#allocation3], 1 }
  0x27   :  { %45 = vsyncpa [#allocation4], 1 }

</bundles_post_ra>
